<compile_context>
chip_gen: v5e
topology: v5e:2x2
jax: 0.10.0
libtpu: 0.0.40
codegen_flags: <defaults>
</compile_context>

<pallas_src>
import math

import jax
import jax.numpy as jnp
from jax import lax
from jax.experimental import pallas as pl
from jax.experimental.pallas import tpu as pltpu


# ---------------------------------------------------------------------------
# One-shot prep kernel: masked row-softmax of the adjacency, split into its
# off-diagonal part and its diagonal.  Runs once per forward call (grid=()).
# ---------------------------------------------------------------------------
def _adj_softmax_kernel(adj_ref, e_ref, a_nd_ref, d_ref):
    mask = adj_ref[...]                      # (J, J) binary adjacency (learn_mask=False)
    e = e_ref[...]                           # (J, J) learnable edge weights

    a = mask * e + (1.0 - mask) * (-9.0e15)
    a = a - jnp.max(a, axis=1, keepdims=True)
    ex = jnp.exp(a)
    sm = ex / jnp.sum(ex, axis=1, keepdims=True)            # (J, J) row softmax

    # eye built with 2-D iota (no jnp.eye lowering needed in-kernel).
    J = sm.shape[0]
    row = lax.broadcasted_iota(jnp.int32, (J, J), 0)
    col = lax.broadcasted_iota(jnp.int32, (J, J), 1)
    eye = (row == col).astype(sm.dtype)

    a_nd_ref[...] = sm * (1.0 - eye)                          # A * (1 - I)
    d_ref[...] = jnp.sum(sm * eye, axis=1, keepdims=True)     # diag(A) as (J, 1)


def _adj_prep(adj, e):
    J = adj.shape[0]
    return pl.pallas_call(
        _adj_softmax_kernel,
        out_shape=(jax.ShapeDtypeStruct((J, J), jnp.float32),
                   jax.ShapeDtypeStruct((J, 1), jnp.float32)),
    )(adj.astype(jnp.float32), e.astype(jnp.float32))


# ---------------------------------------------------------------------------
# Main kernel: one batch block (BB elements) per grid step.
#   x_ref:    (BB, J, Fin)
#   wc_ref:   (Fin, 2*Fout)      = [W0 | W1]
#   ablk_ref: (BB*J, BB*J)       = kron(I_BB, A*(1-I))   (grid-invariant)
#   dblk_ref: (BB*J, 1)          = tile(diag(A), BB)     (grid-invariant)
#   bias_ref: (1, Fout)
#   o_ref:    (BB, J, Fout)
# ---------------------------------------------------------------------------
def _semgconv_kernel(x_ref, wc_ref, ablk_ref, dblk_ref, bias_ref, o_ref):
    BB, J, Fin = x_ref.shape
    Fout = o_ref.shape[-1]

    # Fused feature matmul: (BB*J, Fin) @ (Fin, 2*Fout).  Leading-dim merge is a
    # layout-free reshape.
    xf = x_ref[...].reshape(BB * J, Fin)
    h = jnp.dot(xf, wc_ref[...], preferred_element_type=jnp.float32)

    h0 = h[:, :Fout]                       # x @ W0
    h1 = h[:, Fout:]                       # x @ W1

    # (A*I)@h0 + (A*(1-I))@h1  ==  diag(A)*h0 + (A*(1-I))@h1
    # Block-diagonal A_blk makes the batched aggregation a single 2-D MXU matmul.
    agg = jnp.dot(ablk_ref[...], h1, preferred_element_type=jnp.float32)
    out = agg + dblk_ref[...] * h0 + bias_ref[...]

    # NOTE: with small Fout (<128) this is a masked vst; blocking the batch keeps
    # it amortized.  Realistic SemGCN hidden sizes (128) store lane-dense.
    o_ref[...] = out.reshape(BB, J, Fout).astype(o_ref.dtype)


def sem_graph_conv(x, W, adj, e, bias, *, block_b=8):
    """x: (B, J, Fin) f32; W: (2, Fin, Fout); adj, e: (J, J); bias: (Fout,)."""
    B, J, Fin = x.shape
    Fout = W.shape[-1]

    # Keep BB moderate: kron(I_BB, A) grows as (BB*J)^2 and its wasted FLOPs with
    # BB; BB=8, J=16 gives a 128x128 operand -- exactly one MXU tile.
    BB = max(1, min(block_b, B))
    Bp = pl.cdiv(B, BB) * BB
    if Bp != B:
        x = jnp.pad(x, ((0, Bp - B), (0, 0), (0, 0)))

    # Fused weight slab [W0 | W1] and 2-D bias.
    Wc = jnp.concatenate([W[0], W[1]], axis=1).astype(jnp.float32)   # (Fin, 2*Fout)
    bias2d = bias.reshape(1, Fout).astype(jnp.float32)

    # Batch-invariant masked softmax, computed once.
    A_nd, diag_A = _adj_prep(adj, e)

    # Block-diagonal expansion (done once per call, outside the grid loop).
    A_blk = jnp.kron(jnp.eye(BB, dtype=jnp.float32), A_nd)   # (BB*J, BB*J)
    d_blk = jnp.tile(diag_A, (BB, 1))                         # (BB*J, 1)

    out = pl.pallas_call(
        _semgconv_kernel,
        out_shape=jax.ShapeDtypeStruct((Bp, J, Fout), x.dtype),
        grid_spec=pltpu.PrefetchScalarGridSpec(
            num_scalar_prefetch=0,
            grid=(Bp // BB,),
            in_specs=[
                pl.BlockSpec((BB, J, Fin), lambda i: (i, 0, 0)),
                pl.BlockSpec((Fin, 2 * Fout), lambda i: (0, 0)),
                pl.BlockSpec((BB * J, BB * J), lambda i: (0, 0)),
                pl.BlockSpec((BB * J, 1), lambda i: (0, 0)),
                pl.BlockSpec((1, Fout), lambda i: (0, 0)),
            ],
            out_specs=pl.BlockSpec((BB, J, Fout), lambda i: (i, 0, 0)),
        ),
        compiler_params=pltpu.CompilerParams(
            dimension_semantics=("parallel",)),
    )(x, Wc, A_blk, d_blk, bias2d)

    return out[:B] if Bp != B else out


def reference_forward(x, W, adj, e, bias):
    """Pure-JAX reference mirroring the PyTorch forward (learn_mask=False)."""
    h0 = jnp.matmul(x, W[0])
    h1 = jnp.matmul(x, W[1])
    mask = adj
    a = mask * e + (1.0 - mask) * (-9.0e15)
    a = jax.nn.softmax(a, axis=1)
    J = adj.shape[0]
    M = jnp.eye(J, dtype=x.dtype)
    out = jnp.matmul(a * M, h0) + jnp.matmul(a * (1.0 - M), h1)
    return out + bias.reshape(1, 1, -1)


if __name__ == "__main__":
    # Small but representative SemGCN shapes: 16 joints, 32->32 features.
    B, J, Fin, Fout = 6, 16, 32, 32   # B=6 with block_b=4 exercises padding + grid=2

    key = jax.random.PRNGKey(0)
    k_w, k_b, k_x = jax.random.split(key, 3)

    # W: xavier_uniform_(gain=1.414) on shape (2, Fin, Fout)
    bound = 1.414 * math.sqrt(6.0 / (Fin + Fout))
    W = jax.random.uniform(k_w, (2, Fin, Fout), jnp.float32, -bound, bound)

    # adjacency: chain graph with self-loops (binary, symmetric)
    adj = (jnp.eye(J) + jnp.eye(J, k=1) + jnp.eye(J, k=-1)).astype(jnp.float32)
    adj = jnp.clip(adj, 0.0, 1.0)

    # e initialized to ones (as in the module); learn_mask=False -> mask = adj
    e = jnp.ones((J, J), jnp.float32)

    # bias ~ U(-stdv, stdv), stdv = 1/sqrt(out_features)
    stdv = 1.0 / math.sqrt(Fout)
    bias = jax.random.uniform(k_b, (Fout,), jnp.float32, -stdv, stdv)

    x = jax.random.normal(k_x, (B, J, Fin), jnp.float32)

    out = sem_graph_conv(x, W, adj, e, bias, block_b=4)
    out = jax.block_until_ready(out)

    ref = reference_forward(x, W, adj, e, bias)
    assert out.shape == (B, J, Fout)
    assert jnp.allclose(out, ref, atol=1e-4, rtol=1e-4), "mismatch vs reference"

    # TODO(synk): learn_mask=True branch (binarize straight-through) not exercised;
    # it only changes how `mask` is derived before the hoisted softmax (a where()).
    print("KERNEL_OK")
</pallas_src>

<mosaic_0001>
module attributes {stable_mosaic.version = 11 : i64} {
  func.func @_adj_softmax_kernel(%arg0: memref<16x16xf32, #tpu.memory_space<vmem>>, %arg1: memref<16x16xf32, #tpu.memory_space<vmem>>, %arg2: memref<16x16xf32, #tpu.memory_space<vmem>>, %arg3: memref<16x1xf32, #tpu.memory_space<vmem>>) attributes {dimension_semantics = [], scalar_prefetch = 0 : i64, scratch_operands = 0 : i64, tpu.core_type = #tpu.core_type<tc>} {
    %c0 = arith.constant 0 : index
    %c0_0 = arith.constant 0 : index
    %0 = vector.load %arg0[%c0, %c0_0] : memref<16x16xf32, #tpu.memory_space<vmem>>, vector<16x16xf32>
    %c0_1 = arith.constant 0 : index
    %c0_2 = arith.constant 0 : index
    %1 = vector.load %arg1[%c0_1, %c0_2] : memref<16x16xf32, #tpu.memory_space<vmem>>, vector<16x16xf32>
    %2 = arith.mulf %0, %1 : vector<16x16xf32>
    %cst = arith.constant 1.000000e+00 : f32
    %3 = vector.broadcast %cst : f32 to vector<16x16xf32>
    %4 = arith.subf %3, %0 : vector<16x16xf32>
    %cst_3 = arith.constant -9.000000e+15 : f32
    %5 = vector.broadcast %cst_3 : f32 to vector<16x16xf32>
    %6 = arith.mulf %4, %5 : vector<16x16xf32>
    %7 = arith.addf %2, %6 : vector<16x16xf32>
    %cst_4 = arith.constant dense<0xFF800000> : vector<16xf32>
    %8 = vector.multi_reduction <maximumf>, %7, %cst_4 [1] : vector<16x16xf32> to vector<16xf32>
    %9 = vector.shape_cast %8 : vector<16xf32> to vector<16x1xf32>
    %10 = vector.broadcast %9 : vector<16x1xf32> to vector<16x16xf32>
    %11 = arith.subf %7, %10 : vector<16x16xf32>
    %12 = math.exp %11 : vector<16x16xf32>
    %cst_5 = arith.constant dense<0.000000e+00> : vector<16xf32>
    %13 = vector.multi_reduction <add>, %12, %cst_5 [1] : vector<16x16xf32> to vector<16xf32>
    %14 = vector.shape_cast %13 : vector<16xf32> to vector<16x1xf32>
    %15 = vector.broadcast %14 : vector<16x1xf32> to vector<16x16xf32>
    %16 = arith.divf %12, %15 : vector<16x16xf32>
    %17 = tpu.iota {dimensions = array<i32: 0>} : vector<16x16xi32>
    %18 = tpu.iota {dimensions = array<i32: 1>} : vector<16x16xi32>
    %19 = arith.cmpi eq, %17, %18 : vector<16x16xi32>
    %20 = arith.extui %19 : vector<16x16xi1> to vector<16x16xi32>
    %21 = arith.sitofp %20 : vector<16x16xi32> to vector<16x16xf32>
    %cst_6 = arith.constant 1.000000e+00 : f32
    %22 = vector.broadcast %cst_6 : f32 to vector<16x16xf32>
    %23 = arith.subf %22, %21 : vector<16x16xf32>
    %24 = arith.mulf %16, %23 : vector<16x16xf32>
    %c0_7 = arith.constant 0 : index
    %c0_8 = arith.constant 0 : index
    %25 = vector.load %arg2[%c0_7, %c0_8] : memref<16x16xf32, #tpu.memory_space<vmem>>, vector<16x16xf32>
    tpu.vector_store %arg2[%c0_7, %c0_8], %24 {strides = array<i32>} : memref<16x16xf32, #tpu.memory_space<vmem>>, vector<16x16xf32>,
    %26 = arith.mulf %16, %21 : vector<16x16xf32>
    %cst_9 = arith.constant dense<0.000000e+00> : vector<16xf32>
    %27 = vector.multi_reduction <add>, %26, %cst_9 [1] : vector<16x16xf32> to vector<16xf32>
    %28 = vector.shape_cast %27 : vector<16xf32> to vector<16x1xf32>
    %c0_10 = arith.constant 0 : index
    %c0_11 = arith.constant 0 : index
    %29 = vector.load %arg3[%c0_10, %c0_11] : memref<16x1xf32, #tpu.memory_space<vmem>>, vector<16x1xf32>
    tpu.vector_store %arg3[%c0_10, %c0_11], %28 {strides = array<i32>} : memref<16x1xf32, #tpu.memory_space<vmem>>, vector<16x1xf32>,
    return
  }
}

</mosaic_0001>

<bundles_post_ra>
// kernel: tpu_custom_call.1
= control target key start
LH: loop header
LB: loop body
LE: loop exit
PB: predicated region body
PF: predicated region fallthrough
CT: control target
= control target key end

     0   :  { %9 = vsyncpa [#allocation3], 0  ;;  %s311_s0 = inlined_call_operand.hbm [shape: f32[16,16], index: 0, kind: input, shape index: {}]   ;;  %s312_s1 = inlined_call_operand.hbm [shape: f32[16,16], index: 1, kind: input, shape index: {}]   ;;  %s313_s2 = inlined_call_operand.hbm [shape: f32[16,16], index: 2, kind: output, shape index: {0}]   ;;  %s314_s3 = inlined_call_operand.vmem [shape: f32[16,1], index: 3, kind: output, shape index: {1}]  }
   0x1   :  { %10 = vsyncpa [#allocation6], 0 }
   0x2   :  { %11 = vsyncpa [#allocation4], 0  ;;  %s16_s14 = sshll.u32 %s311_s0, 4  ;;  %s253_s15 = smov [#allocation2]   ;;  %s17_s14 = int_to_ptr.hbm [resolvable:$true] %s16_s14 }
   0x3   :  { %s18_s16 = sshll.u32 %s253_s15, 4  ;;  %s29_s19 = sshll.u32 %s312_s1, 4  ;;  %s19_s16 = int_to_ptr.vmem [resolvable:$true] %s18_s16  ;;  %s30_s19 = int_to_ptr.hbm [resolvable:$true] %s29_s19 }
   0x4   :  { %s254_s20 = smov 128   ;;  %s255_s21 = smov 8  }
   0x5   :  { %24 = dma.hbm_to_vmem [thread:$0]  %s17_s14, 256, %s19_s16, [#allocation3], %s254_s20, %s254_s20, %s255_s21  }
   0x6   :  { %s256_s22 = smov [#allocation5]  }
   0x7   :  { %s31_s23 = sshll.u32 %s256_s22, 4  ;;  %s32_s23 = int_to_ptr.vmem [resolvable:$true] %s31_s23 }
   0x8   :  { %37 = dma.hbm_to_vmem [thread:$0]  %s30_s19, 256, %s32_s23, [#allocation6], %s254_s20, %s254_s20, %s255_s21  }
   0x9   :  { %247 = dma.done.wait [#allocation3], 256  }
   0xa   :  { %248 = vsyncadd [#allocation3], 4294967040 }
   0xb   :  { %249 = dma.done.wait [#allocation6], 256  }
   0xc   :  { %250 = vsyncadd [#allocation6], 4294967040  ;;  %v46_v0 = vld [vmem:[#allocation2] sm:$0xff]  ;;  %v48_v1 = vld [vmem:[#allocation5] sm:$0xff]  ;;  %vm58_vm0 = vcmask 130048   ;;  %v107_v25 = vlaneseq  ;;  %v257_v35 = vmov 0.0  }
   0xd   :  { %v47_v2 = vld [vmem:[#allocation2 + $0x8] sm:$0xff]  ;;  %v50_v3 = vmul.f32 %v48_v1, %v46_v0  ;;  %v52_v4 = vsub.f32 1.0, %v46_v0  ;;  %v49_v6 = vld [vmem:[#allocation5 + $0x8] sm:$0xff]  ;;  %s258_s0 = smov [#allocation7]   ;;  %s141_s26 = sshll.u32 %s313_s2, 4  ;;  %vm132_vm11 = vcmask 7168   ;;  %s142_s26 = int_to_ptr.hbm [resolvable:$true] %s141_s26 }
   0xe   :  { %v53_v5 = vsub.f32 1.0, %v47_v2  ;;  %v51_v9 = vmul.f32 %v49_v6, %v47_v2  ;;  %v108_v26 = vshrl.u32 %v107_v25, 7  ;;  %v111_v27 = vand.u32 127, %v107_v25  ;;  %s139_s1 = sshll.u32 %s258_s0, 4  ;;  %s140_s1 = int_to_ptr.vmem [resolvable:$true] %s139_s1 }
   0xf   :  { %v54_v7 = vmul.f32 -9e+15, %v52_v4 }
  0x10   :  { %v55_v10 = vmul.f32 -9e+15, %v53_v5  ;;  %vm112_vm1 = vcmp.eq.s32.totalorder %v108_v26, %v111_v27  ;;  %v109_v38 = vadd.s32 8, %v108_v26 }
  0x11   :  { %v56_v8 = vadd.f32 %v54_v7, %v50_v3  ;;  %v159_v36 = vsel %vm112_vm1, 1.0, %v257_v35 }
  0x12   :  { %v57_v12 = vadd.f32 %v55_v10, %v51_v9  ;;  %v118_v43 = vsub.f32 1.0, %v159_v36  ;;  %vm113_vm6 = vcmp.eq.s32.totalorder %v109_v38, %v111_v27 }
  0x13   :  { %v59_v11 = vsel %vm58_vm0, %v56_v8, -inf  ;;  %v160_v52 = vsel %vm113_vm6, 1.0, %v257_v35 }
  0x14   :  { %60 = vmax.xlane.f32.xlu0 %v59_v11  ;;  %v62_v13 = vsel %vm58_vm0, %v57_v12, -inf  ;;  %v119_v57 = vsub.f32 1.0, %v160_v52 }
  0x1c   :  { %63 = vmax.xlane.f32.xlu0 %v62_v13 }
  0x87   :  { %v61_v14 = vpop.xlane.xlu0 %60 }
  0x88   :  { %v65_v15 = vsub.f32 %v56_v8, %v61_v14 }
  0x8a   :  { %v67_v16 = vmul.f32 1.442695, %v65_v15 }
  0x8c   :  { %167 = vpow2.f32 %v67_v16 }
  0x8f   :  { %v64_v17 = vpop.xlane.xlu0 %63 }
  0x90   :  { %v66_v18 = vsub.f32 %v57_v12, %v64_v17 }
  0x92   :  { %v168_v19 = vpop.eup %167  ;;  %v69_v20 = vmul.f32 1.442695, %v66_v18 }
  0x93   :  { %v71_v21 = vsel %vm58_vm0, %v168_v19, 0.0 }
  0x94   :  { %169 = vpow2.f32 %v69_v20  ;;  %72 = vadd.xlane.f32.xlu1 %v71_v21 }
  0x9a   :  { %v170_v22 = vpop.eup %169 }
  0x9b   :  { %v74_v23 = vsel %vm58_vm0, %v170_v22, 0.0 }
  0x9c   :  { %75 = vadd.xlane.f32.xlu1 %v74_v23 }
 0x107   :  { %v73_v24 = vpop.xlane.xlu1 %72 }
 0x108   :  { %171 = vrcp.f32 %v73_v24  ;;  %v88_v32 = vand.u32 2147483648, %v73_v24  ;;  %v86_v34 = vand.u32 2147483647, %v73_v24  ;;  %vm82_vm3 = vweird.f32 %v73_v24 }
 0x10a   :  { %v89_v40 = vor.u32 1.1754944e-38, %v88_v32  ;;  %vm87_vm5 = vcmp.eq.f32.partialorder %v86_v34, 8.507059e+37 }
 0x10e   :  { %v172_v28 = vpop.eup %171 }
 0x10f   :  { %v78_v29 = vmul.f32 %v172_v28, %v73_v24  ;;  %v76_v30 = vpop.xlane.xlu1 %75  ;;  %vm83_vm2 = vweird.f32 %v172_v28 }
 0x110   :  { %173 = vrcp.f32 %v76_v30  ;;  %vm84_vm4 = vmor %vm82_vm3, %vm83_vm2  ;;  %v101_v47 = vand.u32 2147483647, %v76_v30  ;;  %v103_v48 = vand.u32 2147483648, %v76_v30  ;;  %vm97_vm8 = vweird.f32 %v76_v30 }
 0x111   :  { %v79_v31 = vsub.f32 1.0, %v78_v29 }
 0x112   :  { %v104_v55 = vor.u32 1.1754944e-38, %v103_v48  ;;  %vm102_vm10 = vcmp.eq.f32.partialorder %v101_v47, 8.507059e+37 }
 0x113   :  { %v80_v33 = vmul.f32 %v172_v28, %v79_v31 }
 0x115   :  { %v81_v37 = vadd.f32 %v172_v28, %v80_v33 }
 0x116   :  { %v174_v39 = vpop.eup %173 }
 0x117   :  { %v93_v41 = vmul.f32 %v174_v39, %v76_v30  ;;  %v85_v42 = vsel %vm84_vm4, %v172_v28, %v81_v37  ;;  %vm98_vm7 = vweird.f32 %v174_v39 }
 0x118   :  { %v90_v44 = vsel %vm87_vm5, %v89_v40, %v85_v42  ;;  %vm99_vm9 = vmor %vm97_vm8, %vm98_vm7 }
 0x119   :  { %v94_v45 = vsub.f32 1.0, %v93_v41  ;;  %v91_v46 = vmul.f32 %v168_v19, %v90_v44 }
 0x11b   :  { %v95_v49 = vmul.f32 %v174_v39, %v94_v45  ;;  %v124_v50 = vmul.f32 %v159_v36, %v91_v46  ;;  %v120_v51 = vmul.f32 %v118_v43, %v91_v46 }
 0x11d   :  { %v96_v53 = vadd.f32 %v174_v39, %v95_v49  ;;  %v126_v54 = vsel %vm58_vm0, %v124_v50, 0.0  ;;  %122 = vst.msk [vmem:[#allocation7] sm:$0xff] %vm58_vm0, %v120_v51 }
 0x11e   :  { %127 = vadd.xlane.f32.xlu2 %v126_v54 }
 0x11f   :  { %v100_v56 = vsel %vm99_vm9, %v174_v39, %v96_v53 }
 0x120   :  { %v105_v58 = vsel %vm102_vm10, %v104_v55, %v100_v56 }
 0x121   :  { %v106_v59 = vmul.f32 %v170_v22, %v105_v58 }
 0x123   :  { %v125_v60 = vmul.f32 %v160_v52, %v106_v59  ;;  %v121_v61 = vmul.f32 %v119_v57, %v106_v59 }
 0x125   :  { %v129_v62 = vsel %vm58_vm0, %v125_v60, 0.0  ;;  %123 = vst.msk [vmem:[#allocation7 + $0x8] sm:$0xff] %vm58_vm0, %v121_v61 }
 0x126   :  { %130 = vadd.xlane.f32.xlu2 %v129_v62  ;;  %147 = dma.vmem_to_hbm [thread:$0]  %s140_s1, 256, %s142_s26, [#allocation4], %s254_s20, %s254_s20, %s255_s21  }
 0x191   :  { %v128_v63 = vpop.xlane.xlu2 %127 }
 0x192   :  { %133 = vst.msk [vmem:[%s314_s3] sm:$0xff] %vm132_vm11, %v128_v63 }
 0x199   :  { %v131_v0 = vpop.xlane.xlu2 %130 }
 0x19a   :  { %134 = vst.msk [vmem:[%s314_s3 + $0x8] sm:$0xff] %vm132_vm11, %v131_v0 }
 0x19b   :  { %251 = dma.done.wait [#allocation4], 256  }
 0x19c   :  { %252 = vsyncadd [#allocation4], 4294967040 }
 0x19d   :  { %156 = vsyncpa [#allocation3], 1 }
 0x19e   :  { %157 = vsyncpa [#allocation6], 1 }
 0x19f   :  { %158 = vsyncpa [#allocation4], 1 }

</bundles_post_ra>
